<compile_context>
chip_gen: v7x
topology: tpu7x:2x2x1
jax: 0.10.0
libtpu: 0.0.40
codegen_flags: <defaults>
</compile_context>

<pallas_src>
import math
import numpy as np
import jax
import jax.numpy as jnp
from jax.experimental import pallas as pl
from jax.experimental.pallas import tpu as pltpu


def _round_up(x, m):
    return ((x + m - 1) // m) * m


# ------------------------------------------------------------------ kernel ---
def _make_kernel(hidden_blocks):
    """Kernel closure for a fixed (trace-time static) number of hidden blocks."""

    def kernel(x_ref, *rest):
        out_ref = rest[-1]
        w = rest[:-1]  # flat [W0, b0, W1, b1, ..., W_out, b_out] VMEM refs

        x = x_ref[...]                                                     # (bn, in)
        # input layer + ReLU  (MXU matmul, f32 accumulate; bias/ReLU on VPU)
        x = jnp.maximum(
            jnp.dot(x, w[0][...], preferred_element_type=jnp.float32) + w[1][...], 0.0)
        idx = 2
        # hidden blocks: Linear -> ReLU
        for _ in range(hidden_blocks):
            x = jnp.maximum(
                jnp.dot(x, w[idx][...], preferred_element_type=jnp.float32)
                + w[idx + 1][...], 0.0)
            idx += 2
        # output layer (lane-padded to a multiple of 128 by the wrapper)
        out_ref[...] = (
            jnp.dot(x, w[idx][...], preferred_element_type=jnp.float32) + w[idx + 1][...])

    return kernel


# ----------------------------------------------------------------- wrapper ---
def mlp_forward(x, params, *, hidden_blocks, out_features, bn=256):
    N, Fin = x.shape
    hidden_features = params[0][0].shape[1]

    # Large batch tile (multiple of 8 sublanes / ideally 128+), but never larger
    # than the rounded-up batch so small test batches still work.
    bn_eff = max(8, min(_round_up(bn, 8), _round_up(N, 8)))
    N_pad = _round_up(N, bn_eff)
    grid = (N_pad // bn_eff,)
    if N_pad != N:
        x = jnp.pad(x, ((0, N_pad - N), (0, 0)))  # zero-row tail, sliced off below

    # Lane-pad the hidden and output feature dims to multiples of 128.  Zero
    # padding is numerically exact (padded activations are ReLU(0)=0 and padded
    # weight rows are 0), and it makes every MXU operand and the output
    # writeback unmasked / lane-dense.
    H_pad = _round_up(hidden_features, 128)
    out_pad = _round_up(out_features, 128)

    padded_params = []
    # input layer: (Fin, H) -> (Fin, H_pad)
    W0, b0 = params[0]
    padded_params.append((
        jnp.pad(W0, ((0, 0), (0, H_pad - hidden_features))),
        jnp.pad(b0, ((0, 0), (0, H_pad - hidden_features))),
    ))
    # hidden layers: (H, H) -> (H_pad, H_pad)
    for i in range(hidden_blocks):
        Wi, bi = params[1 + i]
        padded_params.append((
            jnp.pad(Wi, ((0, H_pad - hidden_features), (0, H_pad - hidden_features))),
            jnp.pad(bi, ((0, 0), (0, H_pad - hidden_features))),
        ))
    # output layer: (H, out) -> (H_pad, out_pad)
    W_last, b_last = params[-1]
    padded_params.append((
        jnp.pad(W_last, ((0, H_pad - hidden_features), (0, out_pad - out_features))),
        jnp.pad(b_last, ((0, 0), (0, out_pad - out_features))),
    ))

    flat_w = [a for (W, b) in padded_params for a in (W, b)]

    in_specs = [pl.BlockSpec((bn_eff, Fin), lambda i: (i, 0))] + [
        # weights/biases: full arrays, VMEM-resident (constant block index)
        pl.BlockSpec(a.shape, lambda i: (0, 0)) for a in flat_w
    ]
    out_spec = pl.BlockSpec((bn_eff, out_pad), lambda i: (i, 0))

    out = pl.pallas_call(
        _make_kernel(hidden_blocks),
        out_shape=jax.ShapeDtypeStruct((N_pad, out_pad), jnp.float32),
        grid=grid,
        in_specs=in_specs,
        out_specs=out_spec,
        compiler_params=pltpu.CompilerParams(
            dimension_semantics=("parallel",),   # megacore-shard the batch axis
            vmem_limit_bytes=32 * 1024 * 1024,   # explicit budget (safe on v5e/v6e/v7x)
        ),
    )(x, *flat_w)
    return out[:N, :out_features]


# ------------------------------------------------------- deterministic init ---
def init_params(key, in_features, hidden_features, hidden_blocks, out_features):
    """nn.Linear-style U(-1/sqrt(fan_in), 1/sqrt(fan_in)); W stored as (in, out)."""
    dims = [(in_features, hidden_features)]
    dims += [(hidden_features, hidden_features)] * hidden_blocks
    dims += [(hidden_features, out_features)]

    params = []
    for fan_in, fan_out in dims:
        key, k1, k2 = jax.random.split(key, 3)
        bound = 1.0 / math.sqrt(fan_in)
        W = jax.random.uniform(k1, (fan_in, fan_out), jnp.float32, -bound, bound)
        b = jax.random.uniform(k2, (1, fan_out), jnp.float32, -bound, bound)
        params.append((W, b))
    return params


# ----------------------------------------------------------- pure-JAX ref ---
def reference_forward(x, params, *, hidden_blocks):
    hi = jax.lax.Precision.HIGHEST
    W, b = params[0]
    x = jnp.maximum(jnp.dot(x, W, precision=hi) + b, 0.0)
    for i in range(hidden_blocks):
        W, b = params[1 + i]
        x = jnp.maximum(jnp.dot(x, W, precision=hi) + b, 0.0)
    W, b = params[-1]
    return jnp.dot(x, W, precision=hi) + b


# -------------------------------------------------------------------- main ---
if __name__ == "__main__":
    in_features = 8
    hidden_features = 32
    hidden_blocks = 2
    out_features = 3
    N = 500          # deliberately not a multiple of the tile to exercise the tail
    bn = 128         # >= 2 grid steps for this N (megacore), 128-aligned M

    key = jax.random.PRNGKey(0)
    key, kp, kx = jax.random.split(key, 3)
    params = init_params(kp, in_features, hidden_features, hidden_blocks, out_features)
    x = jax.random.uniform(kx, (N, in_features), jnp.float32, -1.0, 1.0)

    out = mlp_forward(x, params, hidden_blocks=hidden_blocks,
                      out_features=out_features, bn=bn)
    out = jax.block_until_ready(out)

    ref = reference_forward(x, params, hidden_blocks=hidden_blocks)
    if out.shape != (N, out_features):
        raise AssertionError(f"unexpected output shape {out.shape}")
    if not np.allclose(np.asarray(out), np.asarray(ref), atol=1e-2, rtol=1e-2):
        raise AssertionError("Pallas kernel output does not match reference")

    # TODO(synk): optional bf16 weight/activation path for v6e/v7x MXU once
    # accuracy requirements allow it; kept f32 here to match the PyTorch module.
    print("KERNEL_OK")
</pallas_src>

<mosaic_0001>
module attributes {stable_mosaic.version = 11 : i64} {
  func.func @kernel(%arg0: i32, %arg1: memref<128x8xf32, #tpu.memory_space<vmem>>, %arg2: memref<8x128xf32, #tpu.memory_space<vmem>>, %arg3: memref<1x128xf32, #tpu.memory_space<vmem>>, %arg4: memref<128x128xf32, #tpu.memory_space<vmem>>, %arg5: memref<1x128xf32, #tpu.memory_space<vmem>>, %arg6: memref<128x128xf32, #tpu.memory_space<vmem>>, %arg7: memref<1x128xf32, #tpu.memory_space<vmem>>, %arg8: memref<128x128xf32, #tpu.memory_space<vmem>>, %arg9: memref<1x128xf32, #tpu.memory_space<vmem>>, %arg10: memref<128x128xf32, #tpu.memory_space<vmem>>) attributes {dimension_semantics = [#tpu.dimension_semantics<parallel>], iteration_bounds = array<i64: 4>, scalar_prefetch = 0 : i64, scratch_operands = 0 : i64, tpu.core_type = #tpu.core_type<tc>, window_params = [{transform_indices = @transform_0, window_bounds = array<i64: 128, 8>}, {pipeline_mode = #tpu.pipeline_mode<synchronous>, transform_indices = @transform_1, window_bounds = array<i64: 8, 128>}, {pipeline_mode = #tpu.pipeline_mode<synchronous>, transform_indices = @transform_2, window_bounds = array<i64: 1, 128>}, {pipeline_mode = #tpu.pipeline_mode<synchronous>, transform_indices = @transform_3, window_bounds = array<i64: 128, 128>}, {pipeline_mode = #tpu.pipeline_mode<synchronous>, transform_indices = @transform_4, window_bounds = array<i64: 1, 128>}, {pipeline_mode = #tpu.pipeline_mode<synchronous>, transform_indices = @transform_5, window_bounds = array<i64: 128, 128>}, {pipeline_mode = #tpu.pipeline_mode<synchronous>, transform_indices = @transform_6, window_bounds = array<i64: 1, 128>}, {pipeline_mode = #tpu.pipeline_mode<synchronous>, transform_indices = @transform_7, window_bounds = array<i64: 128, 128>}, {pipeline_mode = #tpu.pipeline_mode<synchronous>, transform_indices = @transform_8, window_bounds = array<i64: 1, 128>}, {transform_indices = @transform_9, window_bounds = array<i64: 128, 128>}]} {
    %c0 = arith.constant 0 : index
    %c0_0 = arith.constant 0 : index
    %0 = vector.load %arg1[%c0, %c0_0] : memref<128x8xf32, #tpu.memory_space<vmem>>, vector<128x8xf32>
    %c0_1 = arith.constant 0 : index
    %c0_2 = arith.constant 0 : index
    %1 = vector.load %arg2[%c0_1, %c0_2] : memref<8x128xf32, #tpu.memory_space<vmem>>, vector<8x128xf32>
    %cst = arith.constant dense<0.000000e+00> : vector<128x128xf32>
    %2 = tpu.matmul %0, %1, %cst {dimension_numbers = #tpu.dot_dimension_numbers<[1], [0], [0], [1], [0, 0, 1, 1], [], []>} : vector<128x8xf32>, vector<8x128xf32>, vector<128x128xf32> -> vector<128x128xf32>
    %c0_3 = arith.constant 0 : index
    %c0_4 = arith.constant 0 : index
    %3 = vector.load %arg3[%c0_3, %c0_4] : memref<1x128xf32, #tpu.memory_space<vmem>>, vector<1x128xf32>
    %4 = vector.broadcast %3 : vector<1x128xf32> to vector<128x128xf32>
    %5 = arith.addf %2, %4 : vector<128x128xf32>
    %cst_5 = arith.constant 0.000000e+00 : f32
    %6 = vector.broadcast %cst_5 : f32 to vector<128x128xf32>
    %7 = arith.maximumf %5, %6 : vector<128x128xf32>
    %c0_6 = arith.constant 0 : index
    %c0_7 = arith.constant 0 : index
    %8 = vector.load %arg4[%c0_6, %c0_7] : memref<128x128xf32, #tpu.memory_space<vmem>>, vector<128x128xf32>
    %cst_8 = arith.constant dense<0.000000e+00> : vector<128x128xf32>
    %9 = tpu.matmul %7, %8, %cst_8 {dimension_numbers = #tpu.dot_dimension_numbers<[1], [0], [0], [1], [0, 0, 1, 1], [], []>} : vector<128x128xf32>, vector<128x128xf32>, vector<128x128xf32> -> vector<128x128xf32>
    %c0_9 = arith.constant 0 : index
    %c0_10 = arith.constant 0 : index
    %10 = vector.load %arg5[%c0_9, %c0_10] : memref<1x128xf32, #tpu.memory_space<vmem>>, vector<1x128xf32>
    %11 = vector.broadcast %10 : vector<1x128xf32> to vector<128x128xf32>
    %12 = arith.addf %9, %11 : vector<128x128xf32>
    %cst_11 = arith.constant 0.000000e+00 : f32
    %13 = vector.broadcast %cst_11 : f32 to vector<128x128xf32>
    %14 = arith.maximumf %12, %13 : vector<128x128xf32>
    %c0_12 = arith.constant 0 : index
    %c0_13 = arith.constant 0 : index
    %15 = vector.load %arg6[%c0_12, %c0_13] : memref<128x128xf32, #tpu.memory_space<vmem>>, vector<128x128xf32>
    %cst_14 = arith.constant dense<0.000000e+00> : vector<128x128xf32>
    %16 = tpu.matmul %14, %15, %cst_14 {dimension_numbers = #tpu.dot_dimension_numbers<[1], [0], [0], [1], [0, 0, 1, 1], [], []>} : vector<128x128xf32>, vector<128x128xf32>, vector<128x128xf32> -> vector<128x128xf32>
    %c0_15 = arith.constant 0 : index
    %c0_16 = arith.constant 0 : index
    %17 = vector.load %arg7[%c0_15, %c0_16] : memref<1x128xf32, #tpu.memory_space<vmem>>, vector<1x128xf32>
    %18 = vector.broadcast %17 : vector<1x128xf32> to vector<128x128xf32>
    %19 = arith.addf %16, %18 : vector<128x128xf32>
    %cst_17 = arith.constant 0.000000e+00 : f32
    %20 = vector.broadcast %cst_17 : f32 to vector<128x128xf32>
    %21 = arith.maximumf %19, %20 : vector<128x128xf32>
    %c0_18 = arith.constant 0 : index
    %c0_19 = arith.constant 0 : index
    %22 = vector.load %arg8[%c0_18, %c0_19] : memref<128x128xf32, #tpu.memory_space<vmem>>, vector<128x128xf32>
    %cst_20 = arith.constant dense<0.000000e+00> : vector<128x128xf32>
    %23 = tpu.matmul %21, %22, %cst_20 {dimension_numbers = #tpu.dot_dimension_numbers<[1], [0], [0], [1], [0, 0, 1, 1], [], []>} : vector<128x128xf32>, vector<128x128xf32>, vector<128x128xf32> -> vector<128x128xf32>
    %c0_21 = arith.constant 0 : index
    %c0_22 = arith.constant 0 : index
    %24 = vector.load %arg9[%c0_21, %c0_22] : memref<1x128xf32, #tpu.memory_space<vmem>>, vector<1x128xf32>
    %25 = vector.broadcast %24 : vector<1x128xf32> to vector<128x128xf32>
    %26 = arith.addf %23, %25 : vector<128x128xf32>
    %c0_23 = arith.constant 0 : index
    %c0_24 = arith.constant 0 : index
    %27 = vector.load %arg10[%c0_23, %c0_24] : memref<128x128xf32, #tpu.memory_space<vmem>>, vector<128x128xf32>
    tpu.vector_store %arg10[%c0_23, %c0_24], %26 {strides = array<i32>} : memref<128x128xf32, #tpu.memory_space<vmem>>, vector<128x128xf32>,
    return
  }
  func.func @transform_0(%arg0: i32) -> (i32, i32) {
    %c0_i32 = arith.constant 0 : i32
    %c0_i32_0 = arith.constant 0 : i32
    return %arg0, %c0_i32 : i32, i32
  }
  func.func @transform_1(%arg0: i32) -> (i32, i32) {
    %c0_i32 = arith.constant 0 : i32
    %c0_i32_0 = arith.constant 0 : i32
    %c0_i32_1 = arith.constant 0 : i32
    return %c0_i32, %c0_i32_0 : i32, i32
  }
  func.func @transform_2(%arg0: i32) -> (i32, i32) {
    %c0_i32 = arith.constant 0 : i32
    %c0_i32_0 = arith.constant 0 : i32
    %c0_i32_1 = arith.constant 0 : i32
    return %c0_i32, %c0_i32_0 : i32, i32
  }
  func.func @transform_3(%arg0: i32) -> (i32, i32) {
    %c0_i32 = arith.constant 0 : i32
    %c0_i32_0 = arith.constant 0 : i32
    %c0_i32_1 = arith.constant 0 : i32
    return %c0_i32, %c0_i32_0 : i32, i32
  }
  func.func @transform_4(%arg0: i32) -> (i32, i32) {
    %c0_i32 = arith.constant 0 : i32
    %c0_i32_0 = arith.constant 0 : i32
    %c0_i32_1 = arith.constant 0 : i32
    return %c0_i32, %c0_i32_0 : i32, i32
  }
  func.func @transform_5(%arg0: i32) -> (i32, i32) {
    %c0_i32 = arith.constant 0 : i32
    %c0_i32_0 = arith.constant 0 : i32
    %c0_i32_1 = arith.constant 0 : i32
    return %c0_i32, %c0_i32_0 : i32, i32
  }
  func.func @transform_6(%arg0: i32) -> (i32, i32) {
    %c0_i32 = arith.constant 0 : i32
    %c0_i32_0 = arith.constant 0 : i32
    %c0_i32_1 = arith.constant 0 : i32
    return %c0_i32, %c0_i32_0 : i32, i32
  }
  func.func @transform_7(%arg0: i32) -> (i32, i32) {
    %c0_i32 = arith.constant 0 : i32
    %c0_i32_0 = arith.constant 0 : i32
    %c0_i32_1 = arith.constant 0 : i32
    return %c0_i32, %c0_i32_0 : i32, i32
  }
  func.func @transform_8(%arg0: i32) -> (i32, i32) {
    %c0_i32 = arith.constant 0 : i32
    %c0_i32_0 = arith.constant 0 : i32
    %c0_i32_1 = arith.constant 0 : i32
    return %c0_i32, %c0_i32_0 : i32, i32
  }
  func.func @transform_9(%arg0: i32) -> (i32, i32) {
    %c0_i32 = arith.constant 0 : i32
    %c0_i32_0 = arith.constant 0 : i32
    return %arg0, %c0_i32 : i32, i32
  }
}

</mosaic_0001>

<bundles_post_ra>
// kernel: tpu_custom_call.1
= control target key start
LH: loop header
LB: loop body
LE: loop exit
PB: predicated region body
PF: predicated region fallthrough
CT: control target
= control target key end

     0   :  { %14 = vsyncpa [#allocation3], 0  ;;  %s2166_s0 = inlined_call_operand.vmem [shape: f32[512,8], index: 0, kind: input, shape index: {}]   ;;  %s2167_s1 = inlined_call_operand.vmem [shape: f32[8,128], index: 1, kind: input, shape index: {}]   ;;  %s2168_s2 = inlined_call_operand.vmem [shape: f32[1,128], index: 2, kind: input, shape index: {}]   ;;  %s2169_s3 = inlined_call_operand.vmem [shape: f32[128,128], index: 3, kind: input, shape index: {}]   ;;  %s2170_s4 = inlined_call_operand.vmem [shape: f32[1,128], index: 4, kind: input, shape index: {}]   ;;  %s2171_s5 = inlined_call_operand.vmem [shape: f32[128,128], index: 5, kind: input, shape index: {}]   ;;  %s2172_s6 = inlined_call_operand.vmem [shape: f32[1,128], index: 6, kind: input, shape index: {}]   ;;  %s2173_s7 = inlined_call_operand.vmem [shape: f32[128,128], index: 7, kind: input, shape index: {}]   ;;  %s2174_s8 = inlined_call_operand.vmem [shape: f32[1,128], index: 8, kind: input, shape index: {}]   ;;  %s2175_s9 = inlined_call_operand.hbm [shape: f32[512,128], index: 9, kind: output, shape index: {}]  }
   0x1   :  { %16 = vsyncpa [#allocation3 + $0x1], 0  ;;  %s1806_s30 = smov 0   ;;  %s1808_s10 = smov 0  }
   0x2   :  { %s1810_s11 = smov 0   ;;  %s1812_s12 = smov 0  }
   0x3 LB: > { %s1827_s13 = sadd.s32 4294967295, %s1751_s12   ;;  %s1196_s14 = sadd.s32 4294967294, %s1751_s12   ;;  %s1751_s12 = sphi %s1812_s12, %s2181_s12   ;;  %s1747_s11 = sphi %s1810_s11, %s2180_s11   ;;  %s1743_s10 = sphi %s1808_s10, %s2179_s10   ;;  %s1739_s30 = sphi %s1806_s30, %s2178_s30  }
   0x4   : > { %s1831_s15 = sadd.s32 1, %s1751_s12   ;;  %s223_s16 = sadd.s32 1, %s1747_s11 }
   0x5   : > { %s220_s17 = ssub.s32 %s1751_s12, %s1831_s15  ;;  %p233_p0 = scmp.ne.s32.totalorder %s1747_s11, %s1743_s10 }
   0x6   : > { %p221_p1 = scmp.eq.s32.totalorder %s220_s17, 0  ;;  %p234_p2 = scmp.eq.s32.totalorder %s1827_s13, 3 }
   0x7   : > { %p239_p3 = scmp.ne.s32.totalorder %s1743_s10, %s1739_s30  ;;  %p240_p4 = scmp.eq.s32.totalorder %s1196_s14, 3 }
   0x8   : > { %s1842_s18 = scalar_select %p221_p1, %s1747_s11, %s223_s16  }
   0x9   : > { %p1844_p5 = por %p234_p2, %p233_p0  ;;  %p1848_p6 = por %p240_p4, %p239_p3 }
   0xa   : > { %p1199_p7 = scmp.ge.s32.totalorder %s1751_s12, 1  ;;  %p291_p8 = scmp.lt.s32.totalorder %s1751_s12, 5 }
   0xc   : > { %p292_p9 = pnand %p1199_p7, %p291_p8 }
   0xd   : > { %v350_v0 = vld [vmem:[%s2167_s1] sm:$0xff] (!%p292_p9)  ;;  %s1201_s23 = sshll.u32 (!%p292_p9), %s1827_s13, 4  ;;  %v569_v2 = vld [vmem:[%s2169_s3 + $0x8] sm:$0xff] (!%p292_p9)  ;;  %v570_v4 = vld [vmem:[%s2169_s3 + $0x10] sm:$0xff] (!%p292_p9)  ;;  %vm358_vm0 = vcmask (!%p292_p9), 64512   ;;  %s324_s24 = sand.u32 (!%p292_p9), 1, %s1743_s10  }
   0xe   : > { %295 = sbr.rel (%p292_p9) target bundleno = 938 (0x3aa), region = 56  ;;  %v568_v1 = vld [vmem:[%s2169_s3] sm:$0xff] (!%p292_p9)  ;;  %1342 = vmatprep.subr.mxu0 (!%p292_p9), %v350_v0  ;;  %p328_p10 = scmp.lt.s32.totalorder (!%p292_p9), %s1201_s23, 63  ;;  %v571_v5 = vld [vmem:[%s2169_s3 + $0x18] sm:$0xff] (!%p292_p9)  ;;  %v573_v8 = vld [vmem:[%s2169_s3 + $0x28] sm:$0xff] (!%p292_p9) }
   0xf   : > { %v1536_v3 = vpack.c.bf16 (!%p292_p9), %v569_v2, %v568_v1  ;;  %1343 = vmatpush3.msra.mxu0 (!%p292_p9), %v350_v0  ;;  %v1540_v6 = vpack.c.bf16 (!%p292_p9), %v571_v5, %v570_v4  ;;  %v572_v7 = vld [vmem:[%s2169_s3 + $0x20] sm:$0xff] (!%p292_p9)  ;;  %v574_v10 = vld [vmem:[%s2169_s3 + $0x30] sm:$0xff] (!%p292_p9)  ;;  %v575_v11 = vld [vmem:[%s2169_s3 + $0x38] sm:$0xff] (!%p292_p9)  ;;  %s1228_s14 = sshll.u32 (!%p292_p9), %s1827_s13, 11  ;;  %s2125_s13 = scalar_lea.sflag (!%p292_p9), [#allocation3], %s324_s24 }
  0x10   : > { %v1544_v9 = vpack.c.bf16 (!%p292_p9), %v573_v8, %v572_v7  ;;  %v1548_v15 = vpack.c.bf16 (!%p292_p9), %v575_v11, %v574_v10  ;;  %v576_v17 = vld [vmem:[%s2169_s3 + $0x40] sm:$0xff] (!%p292_p9)  ;;  %v577_v18 = vld [vmem:[%s2169_s3 + $0x48] sm:$0xff] (!%p292_p9)  ;;  %v578_v22 = vld [vmem:[%s2169_s3 + $0x50] sm:$0xff] (!%p292_p9)  ;;  %s1753_s22 = smov (!%p292_p9), [#allocation2]  }
  0x11   : > { %1537 = vmatprep.subr.bf16.mxu1 (!%p292_p9), %v1536_v3  ;;  %v1552_v20 = vpack.c.bf16 (!%p292_p9), %v577_v18, %v576_v17  ;;  %v579_v23 = vld [vmem:[%s2169_s3 + $0x58] sm:$0xff] (!%p292_p9)  ;;  %v580_v27 = vld [vmem:[%s2169_s3 + $0x60] sm:$0xff] (!%p292_p9)  ;;  %v581_v28 = vld [vmem:[%s2169_s3 + $0x68] sm:$0xff] (!%p292_p9) }
  0x12   : > { %1539 = vmatpush3.bf16.msra.mxu1 (!%p292_p9), %v1536_v3  ;;  %v1556_v25 = vpack.c.bf16 (!%p292_p9), %v579_v23, %v578_v22  ;;  %v1560_v30 = vpack.c.bf16 (!%p292_p9), %v581_v28, %v580_v27  ;;  %v582_v38 = vld [vmem:[%s2169_s3 + $0x70] sm:$0xff] (!%p292_p9)  ;;  %v583_v39 = vld [vmem:[%s2169_s3 + $0x78] sm:$0xff] (!%p292_p9)  ;;  %v752_v41 = vld [vmem:[%s2171_s5] sm:$0xff] (!%p292_p9) }
  0x13   : > { %1541 = vmatprep.subr.bf16.mxu1 (!%p292_p9), %v1540_v6  ;;  %v1564_v40 = vpack.c.bf16 (!%p292_p9), %v583_v39, %v582_v38  ;;  %v753_v42 = vld [vmem:[%s2171_s5 + $0x8] sm:$0xff] (!%p292_p9)  ;;  %v754_v43 = vld [vmem:[%s2171_s5 + $0x10] sm:$0xff] (!%p292_p9)  ;;  %v755_v45 = vld [vmem:[%s2171_s5 + $0x18] sm:$0xff] (!%p292_p9) }
  0x14   : > { %v1568_v44 = vpack.c.bf16 (!%p292_p9), %v753_v42, %v752_v41  ;;  %v1572_v46 = vpack.c.bf16 (!%p292_p9), %v755_v45, %v754_v43  ;;  %v756_v47 = vld [vmem:[%s2171_s5 + $0x20] sm:$0xff] (!%p292_p9)  ;;  %v757_v48 = vld [vmem:[%s2171_s5 + $0x28] sm:$0xff] (!%p292_p9)  ;;  %v758_v50 = vld [vmem:[%s2171_s5 + $0x30] sm:$0xff] (!%p292_p9) }
  0x15   : > { %s2183_s23 = smov (!%p328_p10, %s1201_s23), 63  ;;  %v1576_v49 = vpack.c.bf16 %v757_v48, %v756_v47  ;;  %v759_v51 = vld [vmem:[%s2171_s5 + $0x38] sm:$0xff]  ;;  %v760_v53 = vld [vmem:[%s2171_s5 + $0x40] sm:$0xff]  ;;  %v761_v54 = vld [vmem:[%s2171_s5 + $0x48] sm:$0xff] }
  0x16   : > { %s1202_s25 = sshll.u32 %s2183_s23, 3  ;;  %1543 = vmatpush3.bf16.msra.mxu1 %v1540_v6  ;;  %1569 = vmatprep.subr.bf16.mxu0 %v1568_v44  ;;  %v1580_v52 = vpack.c.bf16 %v759_v51, %v758_v50  ;;  %v1584_v55 = vpack.c.bf16 %v761_v54, %v760_v53  ;;  %v762_v56 = vld [vmem:[%s2171_s5 + $0x50] sm:$0xff]  ;;  %v763_v57 = vld [vmem:[%s2171_s5 + $0x58] sm:$0xff]  ;;  %v764_v59 = vld [vmem:[%s2171_s5 + $0x60] sm:$0xff]  ;;  %s2117_s23 = scalar_lea.hbm %s2175_s9, %s1228_s14 }
  0x17   : > { %s1879_s28 = scalar_lea.vmem %s2166_s0, %s1202_s25  ;;  %1545 = vmatprep.subr.bf16.mxu1 %v1544_v9  ;;  %v1588_v58 = vpack.c.bf16 %v763_v57, %v762_v56  ;;  %v765_v60 = vld [vmem:[%s2171_s5 + $0x68] sm:$0xff]  ;;  %v1203_v62 = vld [vmem:[%s2168_s2] ss:$0 sm:$0xff]  ;;  %v766_v47 = vld [vmem:[%s2171_s5 + $0x70] sm:$0xff]  ;;  %s1200_s25 = sshll.u32 %s324_s24, 7 }
  0x18   : > { %v334_v12 = vld [vmem:[%s1879_s28] sm:$0xff]  ;;  %v335_v13 = vld [vmem:[%s1879_s28 + $0x8] sm:$0xff]  ;;  %v336_v14 = vld [vmem:[%s1879_s28 + $0x10] sm:$0xff]  ;;  %v1592_v61 = vpack.c.bf16 %v765_v60, %v764_v59  ;;  %s2096_s29 = scalar_lea.vmem [#allocation2], %s1200_s25  ;;  %s1693_s25 = sshll.u32 %s1753_s22, 4  ;;  %s1694_s25 = int_to_ptr.vmem [resolvable:$false] %s1693_s25 }
  0x19   : > { %1344 = vmatprep.mubr.msk.f32.mxu0 %vm358_vm0, %v334_v12  ;;  %v337_v16 = vld [vmem:[%s1879_s28 + $0x18] sm:$0xff]  ;;  %v338_v19 = vld [vmem:[%s1879_s28 + $0x20] sm:$0xff]  ;;  %v339_v21 = vld [vmem:[%s1879_s28 + $0x28] sm:$0xff]  ;;  %s1695_s26 = scalar_lea.vmem %s1694_s25, 4096 }
  0x1a   : > { %1345 = vmatmul.mubr.msk.f32.vlgmr.msra.gmra.mrb[0].mxu0 %vm358_vm0, %v335_v13  ;;  %1547 = vmatpush3.bf16.msra.mxu1 %v1544_v9  ;;  %v340_v24 = vld [vmem:[%s1879_s28 + $0x30] sm:$0xff]  ;;  %v341_v26 = vld [vmem:[%s1879_s28 + $0x38] sm:$0xff]  ;;  %v342_v29 = vld [vmem:[%s1879_s28 + $0x40] sm:$0xff] }
  0x1b   : > { %1347 = vmatprep.mubr.msk.f32.mxu0 %vm358_vm0, %v336_v14  ;;  %1549 = vmatprep.subr.bf16.mxu1 %v1548_v15  ;;  %v343_v31 = vld [vmem:[%s1879_s28 + $0x48] sm:$0xff]  ;;  %v344_v32 = vld [vmem:[%s1879_s28 + $0x50] sm:$0xff]  ;;  %v345_v33 = vld [vmem:[%s1879_s28 + $0x58] sm:$0xff] }
  0x1c   : > { %v346_v34 = vld [vmem:[%s1879_s28 + $0x60] sm:$0xff]  ;;  %v347_v35 = vld [vmem:[%s1879_s28 + $0x68] sm:$0xff]  ;;  %v348_v36 = vld [vmem:[%s1879_s28 + $0x70] sm:$0xff]  ;;  %1571 = vmatpush3.bf16.msra.mxu0 %v1568_v44 }
  0x1d   : > { %v349_v37 = vld [vmem:[%s1879_s28 + $0x78] sm:$0xff]  ;;  %1573 = vmatprep.subr.bf16.mxu0 %v1572_v46  ;;  %v936_v50 = vld [vmem:[%s2173_s7] sm:$0xff]  ;;  %v937_v51 = vld [vmem:[%s2173_s7 + $0x8] sm:$0xff]  ;;  %s1134_s28 = sshll.u32 %s2096_s29, 4  ;;  %s2119_s28 = int_to_ptr.vmem [resolvable:$true] %s1134_s28 }
  0x1e   : > { %1348 = vmatmul.mubr.msk.f32.gmra.mrb[2].mxu0 %vm358_vm0, %v337_v16  ;;  %1551 = vmatpush3.bf16.msra.mxu1 %v1548_v15  ;;  %v767_v48 = vld [vmem:[%s2171_s5 + $0x78] sm:$0xff]  ;;  %v1600_v53 = vpack.c.bf16 %v937_v51, %v936_v50  ;;  %v940_v56 = vld [vmem:[%s2173_s7 + $0x20] sm:$0xff]  ;;  %v941_v57 = vld [vmem:[%s2173_s7 + $0x28] sm:$0xff]  ;;  %s1689_s21 = scalar_lea.vmem %s2119_s28, 2048  ;;  %p1696_p0 = scmp.lt.s32.totalorder %s2119_s28, %s1694_s25 }
  0x1f   : > { %1350 = vmatprep.mubr.msk.f32.mxu0 %vm358_vm0, %v338_v19  ;;  %1553 = vmatprep.subr.bf16.mxu1 %v1552_v20  ;;  %v939_v54 = vld [vmem:[%s2173_s7 + $0x18] sm:$0xff]  ;;  %v942_v59 = vld [vmem:[%s2173_s7 + $0x30] sm:$0xff]  ;;  %p1690_p11 = scmp.ne.s32.totalorder %s2119_s28, %s1689_s21  ;;  %p1697_p1 = scmp.lt.s32.totalorder %s1695_s26, %s1689_s21 }
  0x20   : > { %1575 = vmatpush3.bf16.msra.mxu0 %v1572_v46  ;;  %v943_v60 = vld [vmem:[%s2173_s7 + $0x38] sm:$0xff] }
  0x21   : > { %1577 = vmatprep.subr.bf16.mxu0 %v1576_v49  ;;  %p1691_p12 = pnand %p1690_p11, %p1844_p5  ;;  %p1698_p2 = por %p1697_p1, %p1696_p0 }
  0x22   : > { %1351 = vmatmul.mubr.msk.f32.gmra.mrb[4].mxu0 %vm358_vm0, %v339_v21  ;;  %1555 = vmatpush3.bf16.msra.mxu1 %v1552_v20 }
  0x23   : > { %1353 = vmatprep.mubr.msk.f32.mxu0 %vm358_vm0, %v340_v24  ;;  %1557 = vmatprep.subr.bf16.mxu1 %v1556_v25  ;;  %p1692_p13 = pneg %p1691_p12 }
  0x24   : > { %1579 = vmatpush3.bf16.msra.mxu0 %v1576_v49  ;;  %v1596_v49 = vpack.c.bf16 %v767_v48, %v766_v47 }
  0x25   : > { %1581 = vmatprep.subr.bf16.mxu0 %v1580_v52  ;;  %p1699_p3 = pnand %p1698_p2, %p1692_p13 }
  0x26   : > { %1354 = vmatmul.mubr.msk.f32.gmra.mrb[6].mxu0 %vm358_vm0, %v341_v26  ;;  %1559 = vmatpush3.bf16.msra.mxu1 %v1556_v25 }
  0x27   : > { %1356 = vmatprep.mubr.msk.f32.mxu0 %vm358_vm0, %v342_v29  ;;  %1561 = vmatprep.subr.bf16.mxu1 %v1560_v30 }
  0x28   : > { %1583 = vmatpush3.bf16.msra.mxu0 %v1580_v52  ;;  %v938_v52 = vld [vmem:[%s2173_s7 + $0x10] sm:$0xff] }
  0x29   : > { %1585 = vmatprep.subr.bf16.mxu0 %v1584_v55 }
  0x2a   : > { %1357 = vmatmul.mubr.msk.f32.gmra.mrb[8].mxu0 %vm358_vm0, %v343_v31  ;;  %1563 = vmatpush3.bf16.msra.mxu1 %v1560_v30 }
  0x2b   : > { %1359 = vmatprep.mubr.msk.f32.mxu0 %vm358_vm0, %v344_v32  ;;  %1565 = vmatprep.subr.bf16.mxu1 %v1564_v40 }
  0x2c   : > { %1587 = vmatpush3.bf16.msra.mxu0 %v1584_v55  ;;  %v1604_v55 = vpack.c.bf16 %v939_v54, %v938_v52 }
  0x2d   : > { %1589 = vmatprep.subr.bf16.mxu0 %v1588_v58 }
  0x2e   : > { %1360 = vmatmul.mubr.msk.f32.gmra.mrb[10].mxu0 %vm358_vm0, %v345_v33  ;;  %1567 = vmatpush3.bf16.msra.mxu1 %v1564_v40 }
  0x2f   : > { %1362 = vmatprep.mubr.msk.f32.mxu0 %vm358_vm0, %v346_v34  ;;  %1632 = vmatprep.subr.bf16.mxu1 %v1600_v53 }
  0x30   : > { %1591 = vmatpush3.bf16.msra.mxu0 %v1588_v58  ;;  %v1608_v58 = vpack.c.bf16 %v941_v57, %v940_v56  ;;  %v950_v56 = vld [vmem:[%s2173_s7 + $0x70] sm:$0xff]  ;;  %v951_v57 = vld [vmem:[%s2173_s7 + $0x78] sm:$0xff] }
  0x31   : > { %1593 = vmatprep.subr.bf16.mxu0 %v1592_v61 }
  0x32   : > { %1363 = vmatmul.mubr.msk.f32.gmra.mrb[12].mxu0 %vm358_vm0, %v347_v35 }
  0x33   : > { %1365 = vmatprep.mubr.msk.f32.mxu0 %vm358_vm0, %v348_v36 }
  0x34   : > { %1595 = vmatpush3.bf16.msra.mxu0 %v1592_v61  ;;  %v2018_v61 = vpack.c.bf16 %v943_v60, %v942_v59  ;;  %v1221_v59 = vld [vmem:[%s2172_s6] ss:$0 sm:$0xff] }
  0x35   : > { %1597 = vmatprep.subr.bf16.mxu0 %v1596_v49 }
  0x36   : > { %1366 = vmatmul.mubr.msk.f32.gmra.mrb[14].mxu0 %vm358_vm0, %v349_v37 }
  0x38   : > { %1599 = vmatpush3.bf16.msra.mxu0 %v1596_v49 }
  0x39   : > { %1601 = vmatprep.subr.bf16.mxu0 %v1600_v53 }
  0xed   : > { %v1346_v63 = vpop.f32.mrb[0].mxu0 }
  0xee   : > { %v479_v0 = vadd.f32 %v1346_v63, %v1203_v62  ;;  %v473_v1 = vpop.f32.mrb[1].mxu0  ;;  %v945_v63 = vld [vmem:[%s2173_s7 + $0x48] sm:$0xff] }
  0xef   : > { %v474_v2 = vadd.f32 %v1203_v62, %v473_v1  ;;  %v946_v1 = vld [vmem:[%s2173_s7 + $0x50] sm:$0xff] }
  0xf0   : > { %v553_v5 = vmax.f32 %v479_v0, 0.0 }
  0xf1   : > { %v1349_v3 = vpop.f32.mrb[2].mxu0  ;;  %v552_v4 = vmax.f32 %v474_v2, 0.0  ;;  %v947_v2 = vld [vmem:[%s2173_s7 + $0x58] sm:$0xff] }
  0xf2   : > { %v489_v6 = vadd.f32 %v1349_v3, %v1203_v62  ;;  %v483_v7 = vpop.f32.mrb[3].mxu0  ;;  %v2037_v3 = vpack.c.bf16 %v947_v2, %v946_v1 }
  0xf3   : > { %v484_v8 = vadd.f32 %v1203_v62, %v483_v7  ;;  %1400 = vmatprep.mubr.f32.mxu1 %v552_v4  ;;  %v948_v4 = vld [vmem:[%s2173_s7 + $0x60] sm:$0xff] }
  0xf4   : > { %1401 = vmatmul.mubr.f32.vlgmr.msra.gmra.mrb[0].mxu1 %v553_v5  ;;  %v555_v11 = vmax.f32 %v489_v6, 0.0  ;;  %v949_v5 = vld [vmem:[%s2173_s7 + $0x68] sm:$0xff]  ;;  %v2055_v7 = vld [vmem:[%s2170_s4] ss:$0 sm:$0xff] }
  0xf5   : > { %v554_v9 = vmax.f32 %v484_v8, 0.0  ;;  %v1352_v10 = vpop.f32.mrb[4].mxu0  ;;  %1640 = vmatpush3.bf16.msra.mxu1 %v1600_v53  ;;  %v2047_v6 = vpack.c.bf16 %v949_v5, %v948_v4 }
  0xf6   : > { %v499_v12 = vadd.f32 %v1352_v10, %v1203_v62  ;;  %v493_v13 = vpop.f32.mrb[5].mxu0  ;;  %1633 = vmatprep.subr.bf16.mxu1 %v1604_v55 }
  0xf7   : > { %v494_v14 = vadd.f32 %v1203_v62, %v493_v13  ;;  %1403 = vmatprep.mubr.f32.mxu1 %v554_v9 }
  0xf8   : > { %1404 = vmatmul.mubr.f32.gmra.mrb[2].mxu1 %v555_v11  ;;  %v557_v17 = vmax.f32 %v499_v12, 0.0 }
  0xf9   : > { %v556_v15 = vmax.f32 %v494_v14, 0.0  ;;  %v1355_v16 = vpop.f32.mrb[6].mxu0  ;;  %1641 = vmatpush3.bf16.msra.mxu1 %v1604_v55 }
  0xfa   : > { %v509_v18 = vadd.f32 %v1355_v16, %v1203_v62  ;;  %v503_v19 = vpop.f32.mrb[7].mxu0  ;;  %1634 = vmatprep.subr.bf16.mxu1 %v1608_v58 }
  0xfb   : > { %v504_v20 = vadd.f32 %v1203_v62, %v503_v19  ;;  %1406 = vmatprep.mubr.f32.mxu1 %v556_v15 }
  0xfc   : > { %1407 = vmatmul.mubr.f32.gmra.mrb[4].mxu1 %v557_v17  ;;  %v559_v23 = vmax.f32 %v509_v18, 0.0 }
  0xfd   : > { %v558_v21 = vmax.f32 %v504_v20, 0.0  ;;  %v1358_v22 = vpop.f32.mrb[8].mxu0  ;;  %1642 = vmatpush3.bf16.msra.mxu1 %v1608_v58 }
  0xfe   : > { %v519_v24 = vadd.f32 %v1358_v22, %v1203_v62  ;;  %v513_v25 = vpop.f32.mrb[9].mxu0  ;;  %1635 = vmatprep.subr.bf16.mxu1 %v2018_v61 }
  0xff   : > { %v514_v26 = vadd.f32 %v1203_v62, %v513_v25  ;;  %1409 = vmatprep.mubr.f32.mxu1 %v558_v21 }
 0x100   : > { %1410 = vmatmul.mubr.f32.gmra.mrb[6].mxu1 %v559_v23  ;;  %v561_v29 = vmax.f32 %v519_v24, 0.0 }
 0x101   : > { %v560_v27 = vmax.f32 %v514_v26, 0.0  ;;  %v1361_v28 = vpop.f32.mrb[10].mxu0  ;;  %1643 = vmatpush3.bf16.msra.mxu1 %v2018_v61 }
 0x102   : > { %v529_v30 = vadd.f32 %v1361_v28, %v1203_v62  ;;  %v523_v31 = vpop.f32.mrb[11].mxu0 }
 0x103   : > { %v524_v32 = vadd.f32 %v1203_v62, %v523_v31  ;;  %1412 = vmatprep.mubr.f32.mxu1 %v560_v27 }
 0x104   : > { %1413 = vmatmul.mubr.f32.gmra.mrb[8].mxu1 %v561_v29  ;;  %v563_v35 = vmax.f32 %v529_v30, 0.0 }
 0x105   : > { %v562_v33 = vmax.f32 %v524_v32, 0.0  ;;  %v1364_v34 = vpop.f32.mrb[12].mxu0 }
 0x106   : > { %v539_v36 = vadd.f32 %v1364_v34, %v1203_v62  ;;  %v533_v37 = vpop.f32.mrb[13].mxu0 }
 0x107   : > { %v534_v38 = vadd.f32 %v1203_v62, %v533_v37  ;;  %1415 = vmatprep.mubr.f32.mxu1 %v562_v33 }
 0x108   : > { %1416 = vmatmul.mubr.f32.gmra.mrb[10].mxu1 %v563_v35  ;;  %v565_v41 = vmax.f32 %v539_v36, 0.0 }
 0x109   : > { %v564_v39 = vmax.f32 %v534_v38, 0.0  ;;  %v1367_v40 = vpop.f32.mrb[14].mxu0 }
 0x10a   : > { %v549_v42 = vadd.f32 %v1367_v40, %v1203_v62  ;;  %v543_v43 = vpop.f32.mrb[15].mxu0 }
 0x10b   : > { %v544_v44 = vadd.f32 %v1203_v62, %v543_v43  ;;  %1418 = vmatprep.mubr.f32.mxu1 %v564_v39  ;;  %v944_v62 = vld [vmem:[%s2173_s7 + $0x40] sm:$0xff] }
 0x10c   : > { %1419 = vmatmul.mubr.f32.gmra.mrb[12].mxu1 %v565_v41  ;;  %v567_v46 = vmax.f32 %v549_v42, 0.0  ;;  %v2027_v0 = vpack.c.bf16 %v945_v63, %v944_v62 }
 0x10d   : > { %v566_v45 = vmax.f32 %v544_v44, 0.0 }
 0x10e   : > { %1636 = vmatprep.subr.bf16.mxu1 %v2027_v0 }
 0x10f   : > { %1421 = vmatprep.mubr.f32.mxu1 %v566_v45  ;;  %1644 = vmatpush3.bf16.msra.mxu1 %v2027_v0 }
 0x110   : > { %1422 = vmatmul.mubr.f32.gmra.mrb[14].mxu1 %v567_v46  ;;  %1637 = vmatprep.subr.bf16.mxu1 %v2037_v3 }
 0x113   : > { %1645 = vmatpush3.bf16.msra.mxu1 %v2037_v3 }
 0x114   : > { %1638 = vmatprep.subr.bf16.mxu1 %v2047_v6 }
 0x117   : > { %1646 = vmatpush3.bf16.msra.mxu1 %v2047_v6 }
 0x1c7   : > { %v1402_v8 = vpop.f32.mrb[0].mxu1 }
 0x1c8   : > { %v663_v9 = vadd.f32 %v1402_v8, %v2055_v7  ;;  %v657_v10 = vpop.f32.mrb[1].mxu1 }
 0x1c9   : > { %v658_v11 = vadd.f32 %v2055_v7, %v657_v10 }
 0x1ca   : > { %v737_v14 = vmax.f32 %v663_v9, 0.0 }
 0x1cb   : > { %v736_v12 = vmax.f32 %v658_v11, 0.0  ;;  %v1405_v13 = vpop.f32.mrb[2].mxu1 }
 0x1cc   : > { %v673_v15 = vadd.f32 %v1405_v13, %v2055_v7  ;;  %v667_v16 = vpop.f32.mrb[3].mxu1 }
 0x1cd   : > { %v668_v17 = vadd.f32 %v2055_v7, %v667_v16  ;;  %1456 = vmatprep.mubr.f32.mxu0 %v736_v12 }
 0x1ce   : > { %1457 = vmatmul.mubr.f32.vlgmr.msra.gmra.mrb[16].mxu0 %v737_v14  ;;  %v739_v20 = vmax.f32 %v673_v15, 0.0 }
 0x1cf   : > { %v738_v18 = vmax.f32 %v668_v17, 0.0  ;;  %v1408_v19 = vpop.f32.mrb[4].mxu1  ;;  %1603 = vmatpush3.bf16.msra.mxu0 %v1600_v53 }
 0x1d0   : > { %v683_v21 = vadd.f32 %v1408_v19, %v2055_v7  ;;  %v677_v22 = vpop.f32.mrb[5].mxu1  ;;  %1605 = vmatprep.subr.bf16.mxu0 %v1604_v55 }
 0x1d1   : > { %v678_v23 = vadd.f32 %v2055_v7, %v677_v22  ;;  %1459 = vmatprep.mubr.f32.mxu0 %v738_v18 }
 0x1d2   : > { %1460 = vmatmul.mubr.f32.gmra.mrb[18].mxu0 %v739_v20  ;;  %v741_v26 = vmax.f32 %v683_v21, 0.0 }
 0x1d3   : > { %v740_v24 = vmax.f32 %v678_v23, 0.0  ;;  %v1411_v25 = vpop.f32.mrb[6].mxu1  ;;  %1607 = vmatpush3.bf16.msra.mxu0 %v1604_v55 }
 0x1d4   : > { %v693_v27 = vadd.f32 %v1411_v25, %v2055_v7  ;;  %v687_v28 = vpop.f32.mrb[7].mxu1  ;;  %1609 = vmatprep.subr.bf16.mxu0 %v1608_v58 }
 0x1d5   : > { %v688_v29 = vadd.f32 %v2055_v7, %v687_v28  ;;  %1462 = vmatprep.mubr.f32.mxu0 %v740_v24 }
 0x1d6   : > { %1463 = vmatmul.mubr.f32.gmra.mrb[20].mxu0 %v741_v26  ;;  %v743_v32 = vmax.f32 %v693_v27, 0.0 }
 0x1d7   : > { %v742_v30 = vmax.f32 %v688_v29, 0.0  ;;  %v1414_v31 = vpop.f32.mrb[8].mxu1  ;;  %1611 = vmatpush3.bf16.msra.mxu0 %v1608_v58  ;;  %v1628_v58 = vpack.c.bf16 %v951_v57, %v950_v56 }
 0x1d8   : > { %v703_v33 = vadd.f32 %v1414_v31, %v2055_v7  ;;  %v697_v34 = vpop.f32.mrb[9].mxu1  ;;  %1613 = vmatprep.subr.bf16.mxu0 %v2018_v61 }
 0x1d9   : > { %v698_v35 = vadd.f32 %v2055_v7, %v697_v34  ;;  %1465 = vmatprep.mubr.f32.mxu0 %v742_v30  ;;  %1639 = vmatprep.subr.bf16.mxu1 %v1628_v58 }
 0x1da   : > { %1466 = vmatmul.mubr.f32.gmra.mrb[22].mxu0 %v743_v32  ;;  %v745_v38 = vmax.f32 %v703_v33, 0.0  ;;  %1647 = vmatpush3.bf16.msra.mxu1 %v1628_v58 }
 0x1db   : > { %v744_v36 = vmax.f32 %v698_v35, 0.0  ;;  %v1417_v37 = vpop.f32.mrb[10].mxu1  ;;  %1615 = vmatpush3.bf16.msra.mxu0 %v2018_v61 }
 0x1dc   : > { %v713_v39 = vadd.f32 %v1417_v37, %v2055_v7  ;;  %v707_v40 = vpop.f32.mrb[11].mxu1  ;;  %1617 = vmatprep.subr.bf16.mxu0 %v2027_v0 }
 0x1dd   : > { %v708_v41 = vadd.f32 %v2055_v7, %v707_v40  ;;  %1468 = vmatprep.mubr.f32.mxu0 %v744_v36 }
 0x1de   : > { %1469 = vmatmul.mubr.f32.gmra.mrb[24].mxu0 %v745_v38  ;;  %v747_v44 = vmax.f32 %v713_v39, 0.0 }
 0x1df   : > { %v746_v42 = vmax.f32 %v708_v41, 0.0  ;;  %v1420_v43 = vpop.f32.mrb[12].mxu1  ;;  %1619 = vmatpush3.bf16.msra.mxu0 %v2027_v0 }
 0x1e0   : > { %v723_v45 = vadd.f32 %v1420_v43, %v2055_v7  ;;  %v717_v46 = vpop.f32.mrb[13].mxu1  ;;  %1621 = vmatprep.subr.bf16.mxu0 %v2037_v3 }
 0x1e1   : > { %v718_v47 = vadd.f32 %v2055_v7, %v717_v46  ;;  %1471 = vmatprep.mubr.f32.mxu0 %v746_v42 }
 0x1e2   : > { %1472 = vmatmul.mubr.f32.gmra.mrb[26].mxu0 %v747_v44  ;;  %v749_v50 = vmax.f32 %v723_v45, 0.0  ;;  %v1222_v44 = vld [vmem:[%s2174_s8] ss:$0 sm:$0xff] }
 0x1e3   : > { %v748_v48 = vmax.f32 %v718_v47, 0.0  ;;  %v1423_v49 = vpop.f32.mrb[14].mxu1  ;;  %1623 = vmatpush3.bf16.msra.mxu0 %v2037_v3 }
 0x1e4   : > { %v733_v51 = vadd.f32 %v1423_v49, %v2055_v7  ;;  %v727_v52 = vpop.f32.mrb[15].mxu1  ;;  %1625 = vmatprep.subr.bf16.mxu0 %v2047_v6 }
 0x1e5   : > { %v728_v53 = vadd.f32 %v2055_v7, %v727_v52  ;;  %1474 = vmatprep.mubr.f32.mxu0 %v748_v48 }
 0x1e6   : > { %1475 = vmatmul.mubr.f32.gmra.mrb[28].mxu0 %v749_v50  ;;  %v751_v55 = vmax.f32 %v733_v51, 0.0 }
 0x1e7   : > { %v750_v54 = vmax.f32 %v728_v53, 0.0  ;;  %1627 = vmatpush3.bf16.msra.mxu0 %v2047_v6 }
 0x1e8   : > { %1629 = vmatprep.subr.bf16.mxu0 %v1628_v58 }
 0x1e9   : > { %1477 = vmatprep.mubr.f32.mxu0 %v750_v54 }
 0x1ea   : > { %1478 = vmatmul.mubr.f32.gmra.mrb[30].mxu0 %v751_v55 }
 0x1eb   : > { %1631 = vmatpush3.bf16.msra.mxu0 %v1628_v58 }
 0x2a1   : > { %v1458_v60 = vpop.f32.mrb[16].mxu0 }
 0x2a2   : > { %v847_v61 = vadd.f32 %v1458_v60, %v1221_v59  ;;  %v841_v62 = vpop.f32.mrb[17].mxu0 }
 0x2a3   : > { %v842_v63 = vadd.f32 %v1221_v59, %v841_v62 }
 0x2a4   : > { %v921_v2 = vmax.f32 %v847_v61, 0.0 }
 0x2a5   : > { %v920_v0 = vmax.f32 %v842_v63, 0.0  ;;  %v1461_v1 = vpop.f32.mrb[18].mxu0 }
 0x2a6   : > { %v857_v3 = vadd.f32 %v1461_v1, %v1221_v59  ;;  %v851_v4 = vpop.f32.mrb[19].mxu0 }
 0x2a7   : > { %v852_v5 = vadd.f32 %v1221_v59, %v851_v4  ;;  %1512 = vmatprep.mubr.f32.mxu0 %v920_v0 }
 0x2a8   : > { %1513 = vmatmul.mubr.f32.vlgmr.msra.gmra.mrb[32].mxu0 %v921_v2  ;;  %v923_v8 = vmax.f32 %v857_v3, 0.0 }
 0x2a9   : > { %v922_v6 = vmax.f32 %v852_v5, 0.0  ;;  %v1464_v7 = vpop.f32.mrb[20].mxu0 }
 0x2aa   : > { %v867_v9 = vadd.f32 %v1464_v7, %v1221_v59  ;;  %v861_v10 = vpop.f32.mrb[21].mxu0 }
 0x2ab   : > { %v862_v11 = vadd.f32 %v1221_v59, %v861_v10  ;;  %1515 = vmatprep.mubr.f32.mxu0 %v922_v6 }
 0x2ac   : > { %1516 = vmatmul.mubr.f32.gmra.mrb[34].mxu0 %v923_v8  ;;  %v925_v14 = vmax.f32 %v867_v9, 0.0 }
 0x2ad   : > { %v924_v12 = vmax.f32 %v862_v11, 0.0  ;;  %v1467_v13 = vpop.f32.mrb[22].mxu0 }
 0x2ae   : > { %v877_v15 = vadd.f32 %v1467_v13, %v1221_v59  ;;  %v871_v16 = vpop.f32.mrb[23].mxu0 }
 0x2af   : > { %v872_v17 = vadd.f32 %v1221_v59, %v871_v16  ;;  %1518 = vmatprep.mubr.f32.mxu0 %v924_v12 }
 0x2b0   : > { %1519 = vmatmul.mubr.f32.gmra.mrb[36].mxu0 %v925_v14  ;;  %v927_v20 = vmax.f32 %v877_v15, 0.0 }
 0x2b1   : > { %v926_v18 = vmax.f32 %v872_v17, 0.0  ;;  %v1470_v19 = vpop.f32.mrb[24].mxu0 }
 0x2b2   : > { %v887_v21 = vadd.f32 %v1470_v19, %v1221_v59  ;;  %v881_v22 = vpop.f32.mrb[25].mxu0 }
 0x2b3   : > { %v882_v23 = vadd.f32 %v1221_v59, %v881_v22  ;;  %1521 = vmatprep.mubr.f32.mxu1 %v926_v18 }
 0x2b4   : > { %1522 = vmatmul.mubr.f32.vlgmr.msra.gmra.mrb[16].mxu1 %v927_v20  ;;  %v929_v26 = vmax.f32 %v887_v21, 0.0 }
 0x2b5   : > { %v928_v24 = vmax.f32 %v882_v23, 0.0  ;;  %v1473_v25 = vpop.f32.mrb[26].mxu0 }
 0x2b6   : > { %v897_v27 = vadd.f32 %v1473_v25, %v1221_v59  ;;  %v891_v28 = vpop.f32.mrb[27].mxu0 }
 0x2b7   : > { %v892_v29 = vadd.f32 %v1221_v59, %v891_v28  ;;  %1524 = vmatprep.mubr.f32.mxu1 %v928_v24 }
 0x2b8   : > { %1525 = vmatmul.mubr.f32.gmra.mrb[18].mxu1 %v929_v26  ;;  %v931_v32 = vmax.f32 %v897_v27, 0.0 }
 0x2b9   : > { %v930_v30 = vmax.f32 %v892_v29, 0.0  ;;  %v1476_v31 = vpop.f32.mrb[28].mxu0 }
 0x2ba   : > { %v907_v33 = vadd.f32 %v1476_v31, %v1221_v59  ;;  %v901_v34 = vpop.f32.mrb[29].mxu0 }
 0x2bb   : > { %v902_v35 = vadd.f32 %v1221_v59, %v901_v34  ;;  %1527 = vmatprep.mubr.f32.mxu1 %v930_v30 }
 0x2bc   : > { %1528 = vmatmul.mubr.f32.gmra.mrb[20].mxu1 %v931_v32  ;;  %v933_v38 = vmax.f32 %v907_v33, 0.0 }
 0x2bd   : > { %v932_v36 = vmax.f32 %v902_v35, 0.0  ;;  %v1479_v37 = vpop.f32.mrb[30].mxu0 }
 0x2be   : > { %v917_v39 = vadd.f32 %v1479_v37, %v1221_v59  ;;  %v911_v40 = vpop.f32.mrb[31].mxu0 }
 0x2bf   : > { %v912_v41 = vadd.f32 %v1221_v59, %v911_v40  ;;  %1530 = vmatprep.mubr.f32.mxu1 %v932_v36 }
 0x2c0   : > { %1531 = vmatmul.mubr.f32.gmra.mrb[22].mxu1 %v933_v38  ;;  %v935_v43 = vmax.f32 %v917_v39, 0.0 }
 0x2c1   : > { %v934_v42 = vmax.f32 %v912_v41, 0.0 }
 0x2c3   : > { %1533 = vmatprep.mubr.f32.mxu1 %v934_v42 }
 0x2c4   : > { %1534 = vmatmul.mubr.f32.gmra.mrb[24].mxu1 %v935_v43 }
 0x37b   : > { %v1514_v45 = vpop.f32.mrb[32].mxu0 }
 0x37c   : > { %v1031_v46 = vadd.f32 %v1514_v45, %v1222_v44  ;;  %v1025_v47 = vpop.f32.mrb[33].mxu0 }
 0x37d   : > { %v1026_v48 = vadd.f32 %v1222_v44, %v1025_v47 }
 0x37e   : > { %1105 = vst [vmem:[%s2096_s29 + $0x8] sm:$0xff] %v1031_v46 }
 0x37f   : > { %1104 = vst [vmem:[%s2096_s29] sm:$0xff] %v1026_v48  ;;  %v1517_v49 = vpop.f32.mrb[34].mxu0 }
 0x380   : > { %v1041_v50 = vadd.f32 %v1517_v49, %v1222_v44  ;;  %v1035_v51 = vpop.f32.mrb[35].mxu0 }
 0x381   : > { %v1036_v52 = vadd.f32 %v1222_v44, %v1035_v51 }
 0x382   : > { %1107 = vst [vmem:[%s2096_s29 + $0x18] sm:$0xff] %v1041_v50 }
 0x383   : > { %1106 = vst [vmem:[%s2096_s29 + $0x10] sm:$0xff] %v1036_v52  ;;  %v1520_v53 = vpop.f32.mrb[36].mxu0 }
 0x384   : > { %v1051_v54 = vadd.f32 %v1520_v53, %v1222_v44  ;;  %v1045_v55 = vpop.f32.mrb[37].mxu0 }
 0x385   : > { %v1046_v56 = vadd.f32 %v1222_v44, %v1045_v55 }
 0x386   : > { %1109 = vst [vmem:[%s2096_s29 + $0x28] sm:$0xff] %v1051_v54 }
 0x387   : > { %1108 = vst [vmem:[%s2096_s29 + $0x20] sm:$0xff] %v1046_v56  ;;  %v1523_v57 = vpop.f32.mrb[16].mxu1 }
 0x388   : > { %v1061_v58 = vadd.f32 %v1523_v57, %v1222_v44  ;;  %v1055_v59 = vpop.f32.mrb[17].mxu1 }
 0x389   : > { %v1056_v60 = vadd.f32 %v1222_v44, %v1055_v59 }
 0x38a   : > { %1111 = vst [vmem:[%s2096_s29 + $0x38] sm:$0xff] %v1061_v58 }
 0x38b   : > { %1110 = vst [vmem:[%s2096_s29 + $0x30] sm:$0xff] %v1056_v60  ;;  %v1526_v61 = vpop.f32.mrb[18].mxu1 }
 0x38c   : > { %v1071_v62 = vadd.f32 %v1526_v61, %v1222_v44  ;;  %v1065_v63 = vpop.f32.mrb[19].mxu1 }
 0x38d   : > { %v1066_v0 = vadd.f32 %v1222_v44, %v1065_v63 }
 0x38e   : > { %1113 = vst [vmem:[%s2096_s29 + $0x48] sm:$0xff] %v1071_v62 }
 0x38f   : > { %1112 = vst [vmem:[%s2096_s29 + $0x40] sm:$0xff] %v1066_v0  ;;  %v1529_v1 = vpop.f32.mrb[20].mxu1 }
 0x390   : > { %v1081_v2 = vadd.f32 %v1529_v1, %v1222_v44  ;;  %v1075_v3 = vpop.f32.mrb[21].mxu1 }
 0x391   : > { %v1076_v4 = vadd.f32 %v1222_v44, %v1075_v3 }
 0x392   : > { %1115 = vst [vmem:[%s2096_s29 + $0x58] sm:$0xff] %v1081_v2 }
 0x393   : > { %1114 = vst [vmem:[%s2096_s29 + $0x50] sm:$0xff] %v1076_v4  ;;  %v1532_v5 = vpop.f32.mrb[22].mxu1 }
 0x394   : > { %v1091_v6 = vadd.f32 %v1532_v5, %v1222_v44  ;;  %v1085_v7 = vpop.f32.mrb[23].mxu1 }
 0x395   : > { %v1086_v8 = vadd.f32 %v1222_v44, %v1085_v7 }
 0x396   : > { %1117 = vst [vmem:[%s2096_s29 + $0x68] sm:$0xff] %v1091_v6 }
 0x397   : > { %1116 = vst [vmem:[%s2096_s29 + $0x60] sm:$0xff] %v1086_v8  ;;  %v1535_v9 = vpop.f32.mrb[24].mxu1 }
 0x398   : > { %v1101_v10 = vadd.f32 %v1535_v9, %v1222_v44  ;;  %v1095_v11 = vpop.f32.mrb[25].mxu1 }
 0x399   : > { %v1096_v12 = vadd.f32 %v1222_v44, %v1095_v11 }
 0x39a   : > { %1119 = vst [vmem:[%s2096_s29 + $0x78] sm:$0xff] %v1101_v10 }
 0x39b   : > { %1118 = vst [vmem:[%s2096_s29 + $0x70] sm:$0xff] %v1096_v12 }
 0x39c   : > { %1702 = shalt.err (!%p1699_p3)
}
 0x39d   : > { %s1703_s24 = scalar_lea.hbm %s2117_s23, 2048  ;;  %s1707_s14 = scalar_lea.hbm %s2175_s9, 8192 }
 0x39e   : > { %p1704_p4 = scmp.ne.s32.totalorder %s2117_s23, %s1703_s24  ;;  %p1708_p9 = scmp.lt.u32.totalorder %s2117_s23, %s2175_s9 }
 0x39f   : > { %p1709_p10 = scmp.lt.u32.totalorder %s1707_s14, %s1703_s24  ;;  %p1711_p12 = scmp.lt.u32.totalorder %s1703_s24, %s2117_s23 }
 0x3a0   : > { %p1705_p7 = pnand %p1704_p4, %p1844_p5 }
 0x3a1   : > { %p1710_p11 = por %p1709_p10, %p1708_p9 }
 0x3a2   : > { %p1706_p8 = pneg %p1705_p7 }
 0x3a3   : > { %p1712_p13 = por %p1711_p12, %p1710_p11 }
 0x3a5   : > { %p1713_p0 = pnand %p1712_p13, %p1706_p8 }
 0x3a7   : > { %1716 = shalt.err (!%p1713_p0)
}
 0x3a8   : > { %s1754_s21 = smov 128   ;;  %s1755_s22 = smov 8  }
 0x3a9   : > { %1648 = dma.vmem_to_hbm [thread:$0]  (%p1844_p5), %s2119_s28, 2048, %s2117_s23, %s2125_s13, %s1754_s21, %s1754_s21, %s1755_s22  }
 0x3aa PF: > { %p1654_p1 = scmp.ge.s32.totalorder %s1751_s12, 2  ;;  %s1149_s25 = sand.u32 1, %s1739_s30  }
 0x3ab   : > { %s1150_s26 = scalar_lea.sflag [#allocation3], %s1149_s25 }
 0x3ac   : > { %p1651_p2 = pnand %p1654_p1, %p1848_p6 }
 0x3ae   : > { %1734 = dma.done.wait (!%p1651_p2), %s1150_s26, 2048  }
 0x3af   : > { %1736 = vsyncadd (!%p1651_p2), %s1150_s26, 4294965248  ;;  %p19_p3 = scmp.ge.s32.totalorder %s1831_s15, 6   ;;  %s2178_s30 = smov %s1743_s10 }
 0x3b0   : > { %s2179_s10 = smov %s1747_s11  ;;  %s2180_s11 = smov %s1842_s18 }
 0x3b1   : > { %s2181_s12 = smov %s1831_s15  ;;  %21 = sbr.rel (!%p19_p3) target bundleno = 3 (0x3), region = 91 }
 0x3b8   :  { %1155 = vsyncpa [#allocation3], 1 }
 0x3b9   :  { %1157 = vsyncpa [#allocation3 + $0x1], 1 }

</bundles_post_ra>
